<compile_context>
chip_gen: v7x
topology: tpu7x:2x2x1
jax: 0.10.0
libtpu: 0.0.40
codegen_flags: <defaults>
</compile_context>

<pallas_src>
import numpy as np
import jax
import jax.numpy as jnp
from jax.experimental import pallas as pl
from jax.experimental.pallas import tpu as pltpu


# ---------------------------------------------------------------------------
# Fused kernel
# ---------------------------------------------------------------------------

def _decoder_kernel(x_ref, enc_ref, mw_ref, uh_ref, me_ref, eb_ref,
                    wa_ref, wb_ref, sdn_ref, sup_ref,
                    sca_ref, sha_ref, scb_ref, shb_ref,
                    o_ref, cat_ref):
    f32, bf16 = jnp.float32, jnp.bfloat16
    half = cat_ref.shape[-1] // 2          # = W2*Cin (128 lanes)

    # --- bilinear x2 upsample (align_corners=True) as two small matmuls:
    #     width (packed into lanes) then height (block-diag over folded batch).
    t = jnp.dot(x_ref[...], mw_ref[...], preferred_element_type=f32)
    xu = jnp.dot(uh_ref[...], t, preferred_element_type=f32)

    # --- enc 1x1 conv as one block-diagonal lane matmul + bias.
    e = jnp.dot(enc_ref[...], me_ref[...], preferred_element_type=f32) + eb_ref[...]

    # --- channel concat == lane concat in the packed layout.  Both halves are
    #     exactly 128 lanes -> tile-aligned, unmasked stores into the scratch.
    cat_ref[:, 0:half] = xu.astype(bf16)
    cat_ref[:, half:2 * half] = e.astype(bf16)
    cat = cat_ref[...]

    # --- convA (3x3, SAME): 3 width-Toeplitz K=256 bf16 dots (one per kernel
    #     row) + 2 exact 0/1 row-shift matmuls for the vertical taps.
    p0 = jnp.dot(cat, wa_ref[0], preferred_element_type=f32)
    p1 = jnp.dot(cat, wa_ref[1], preferred_element_type=f32)
    p2 = jnp.dot(cat, wa_ref[2], preferred_element_type=f32)
    acc = (p1
           + jnp.dot(sdn_ref[...], p0, preferred_element_type=f32)
           + jnp.dot(sup_ref[...], p2, preferred_element_type=f32))
    # fused conv bias + eval-mode BatchNorm + ReLU (per-channel, lane-tiled).
    ya = jnp.maximum(acc * sca_ref[...] + sha_ref[...], 0.0)

    # --- convB (3x3, SAME) + BN + ReLU: same structure, K = W2*Cout = 128.
    yb = ya.astype(bf16)
    q0 = jnp.dot(yb, wb_ref[0], preferred_element_type=f32)
    q1 = jnp.dot(yb, wb_ref[1], preferred_element_type=f32)
    q2 = jnp.dot(yb, wb_ref[2], preferred_element_type=f32)
    acc2 = (q1
            + jnp.dot(sdn_ref[...], q0, preferred_element_type=f32)
            + jnp.dot(sup_ref[...], q2, preferred_element_type=f32))
    # lane-dense (rows, W2*Cout) output store, unmasked.
    o_ref[...] = jnp.maximum(acc2 * scb_ref[...] + shb_ref[...], 0.0)


# ---------------------------------------------------------------------------
# Host-side operator precompute (numpy, runs ONCE per weight set)
# ---------------------------------------------------------------------------

def _bilinear_matrix(n_in, n_out):
    """Bilinear upsample matrix, align_corners=True (matches the PyTorch module)."""
    U = np.zeros((n_out, n_in), np.float32)
    if n_out == 1 or n_in == 1:
        U[:, 0] = 1.0
        return U
    ratio = (n_in - 1) / (n_out - 1)
    for o in range(n_out):
        src = o * ratio
        i0 = int(np.floor(src))
        i1 = min(i0 + 1, n_in - 1)
        frac = src - i0
        U[o, i0] += 1.0 - frac
        U[o, i1] += frac
    return U


def _width_toeplitz(w_hwio, w_out):
    """3x3 SAME conv along packed width as per-kernel-row operators.

    Returns (kh, w_out*Cin, w_out*Cout); the width zero-padding is folded in
    (out-of-range taps simply contribute nothing), so there are NO halo lanes.
    """
    kh, kw, cin, cout = w_hwio.shape
    T = np.zeros((kh, w_out * cin, w_out * cout), np.float32)
    for dy in range(kh):
        for p in range(w_out):
            for dx in range(kw):
                x = p + dx - (kw // 2)
                if 0 <= x < w_out:
                    T[dy, x * cin:(x + 1) * cin, p * cout:(p + 1) * cout] = w_hwio[dy, dx]
    return T


def make_decoder_forward(params, H, W, *, eps=1e-5, batch_block=1):
    """Precompute all operators once and return a jitted forward(x, enc) -> y (NCHW)."""
    p = {k: np.asarray(v, np.float32) for k, v in params.items()}
    Ce, Cin = p["enc_w"].shape
    Cout = p["convA_w"].shape[-1]
    NB = int(batch_block)
    H2, W2 = 2 * H, 2 * W
    f32, bf16 = jnp.float32, jnp.bfloat16

    # bilinear x2 upsample as two matmuls (width packed into lanes, no halo).
    Uw = _bilinear_matrix(W, W2)                                   # (W2, W)
    Uh = _bilinear_matrix(H, H2)                                   # (H2, H)
    mw = np.kron(Uw.T, np.eye(Cin, dtype=np.float32))              # (W*Cin, W2*Cin)
    uh = np.kron(np.eye(NB, dtype=np.float32), Uh)                 # (NB*H2, NB*H)

    # enc 1x1 conv as one block-diagonal lane matmul (+ bias).
    me = np.kron(np.eye(W2, dtype=np.float32), p["enc_w"])         # (W2*Ce, W2*Cin)
    eb = np.tile(p["enc_b"], W2).reshape(1, W2 * Cin)

    # 3x3 convs as width-Toeplitz per kernel row; convA's concat split is fused
    # into a single K = 2*W2*Cin operator (rows 0..127 -> xu branch, 128.. -> enc).
    wa = np.concatenate(
        [_width_toeplitz(p["convA_w"][:, :, :Cin, :], W2),
         _width_toeplitz(p["convA_w"][:, :, Cin:, :], W2)], axis=1)  # (3, 2*W2*Cin, W2*Cout)
    wb = _width_toeplitz(p["convB_w"], W2)                           # (3, W2*Cout, W2*Cout)

    # vertical conv taps: exact 0/1 row-shift operators (block-diag over batch).
    sdn = np.kron(np.eye(NB, dtype=np.float32), np.eye(H2, k=-1, dtype=np.float32))
    sup = np.kron(np.eye(NB, dtype=np.float32), np.eye(H2, k=+1, dtype=np.float32))

    # conv bias + eval-mode BN folded to per-channel scale/shift, lane-tiled.
    scA = p["bnA_g"] / np.sqrt(p["bnA_v"] + eps)
    shA = scA * (p["convA_b"] - p["bnA_m"]) + p["bnA_b"]
    scB = p["bnB_g"] / np.sqrt(p["bnB_v"] + eps)
    shB = scB * (p["convB_b"] - p["bnB_m"]) + p["bnB_b"]
    scA_t = np.tile(scA, W2).reshape(1, W2 * Cout)
    shA_t = np.tile(shA, W2).reshape(1, W2 * Cout)
    scB_t = np.tile(scB, W2).reshape(1, W2 * Cout)
    shB_t = np.tile(shB, W2).reshape(1, W2 * Cout)

    # Device constants (captured by the jitted closure; never rebuilt per call).
    ops = dict(
        mw=jnp.asarray(mw, f32), uh=jnp.asarray(uh, f32),
        me=jnp.asarray(me, f32), eb=jnp.asarray(eb, f32),
        wa=jnp.asarray(wa, bf16), wb=jnp.asarray(wb, bf16),
        sdn=jnp.asarray(sdn, f32), sup=jnp.asarray(sup, f32),
        scA=jnp.asarray(scA_t, f32), shA=jnp.asarray(shA_t, f32),
        scB=jnp.asarray(scB_t, f32), shB=jnp.asarray(shB_t, f32),
    )

    rows_in, rows_out = NB * H, NB * H2

    @jax.jit
    def forward(x_nchw, enc_nchw):
        N = x_nchw.shape[0]
        assert x_nchw.shape == (N, Cin, H, W)
        assert enc_nchw.shape == (N, Ce, H2, W2)
        assert N % NB == 0
        nblk = N // NB

        # NCHW -> width-packed channels-last rows (lane-dense layout).
        x_rows = jnp.transpose(x_nchw, (0, 2, 3, 1)).reshape(N * H, W * Cin)
        enc_rows = jnp.transpose(enc_nchw, (0, 2, 3, 1)).reshape(N * H2, W2 * Ce)

        full2 = lambda b: (0, 0)
        full3 = lambda b: (0, 0, 0)
        out = pl.pallas_call(
            _decoder_kernel,
            out_shape=jax.ShapeDtypeStruct((N * H2, W2 * Cout), jnp.float32),
            grid=(nblk,),
            in_specs=[
                pl.BlockSpec((rows_in, W * Cin), lambda b: (b, 0)),      # x (packed rows)
                pl.BlockSpec((rows_out, W2 * Ce), lambda b: (b, 0)),     # enc (packed rows)
                pl.BlockSpec((W * Cin, W2 * Cin), full2),                # mw  (width upsample)
                pl.BlockSpec((rows_out, rows_in), full2),                # uh  (height upsample)
                pl.BlockSpec((W2 * Ce, W2 * Cin), full2),                # me  (1x1 conv)
                pl.BlockSpec((1, W2 * Cin), full2),                      # eb
                pl.BlockSpec((3, 2 * W2 * Cin, W2 * Cout), full3),       # wa  (convA Toeplitz)
                pl.BlockSpec((3, W2 * Cout, W2 * Cout), full3),          # wb  (convB Toeplitz)
                pl.BlockSpec((rows_out, rows_out), full2),               # row shift (down)
                pl.BlockSpec((rows_out, rows_out), full2),               # row shift (up)
                pl.BlockSpec((1, W2 * Cout), full2),                     # scaleA
                pl.BlockSpec((1, W2 * Cout), full2),                     # shiftA
                pl.BlockSpec((1, W2 * Cout), full2),                     # scaleB
                pl.BlockSpec((1, W2 * Cout), full2),                     # shiftB
            ],
            out_specs=pl.BlockSpec((rows_out, W2 * Cout), lambda b: (b, 0)),
            scratch_shapes=[pltpu.VMEM((rows_out, 2 * W2 * Cin), jnp.bfloat16)],
            compiler_params=pltpu.CompilerParams(
                dimension_semantics=("parallel",)),
        )(x_rows, enc_rows, ops["mw"], ops["uh"], ops["me"], ops["eb"],
          ops["wa"], ops["wb"], ops["sdn"], ops["sup"],
          ops["scA"], ops["shA"], ops["scB"], ops["shB"])

        # packed rows -> NCHW
        return jnp.transpose(out.reshape(N, H2, W2, Cout), (0, 3, 1, 2))

    return forward


# ---------------------------------------------------------------------------
# Pure-JAX reference (for correctness check only)
# ---------------------------------------------------------------------------

def reference_forward(x_nchw, enc_nchw, params, eps=1e-5):
    N, C, H, W = x_nchw.shape
    Uh = jnp.asarray(_bilinear_matrix(H, 2 * H))
    Uw = jnp.asarray(_bilinear_matrix(W, 2 * W))
    xu = jnp.einsum("oh,nchw,pw->ncop", Uh, x_nchw, Uw)
    xu_nhwc = jnp.transpose(xu, (0, 2, 3, 1))
    enc_nhwc = jnp.transpose(enc_nchw, (0, 2, 3, 1))
    e = jnp.einsum("nhwc,cd->nhwd", enc_nhwc, params["enc_w"]) + params["enc_b"]
    cat = jnp.concatenate([xu_nhwc, e], axis=-1)

    def cbr(z, w, b, gamma, beta, mean, var):
        y = jax.lax.conv_general_dilated(
            z, w, (1, 1), "SAME",
            dimension_numbers=("NHWC", "HWIO", "NHWC")) + b
        y = gamma * (y - mean) / jnp.sqrt(var + eps) + beta
        return jnp.maximum(y, 0.0)

    y = cbr(cat, params["convA_w"], params["convA_b"],
            params["bnA_g"], params["bnA_b"], params["bnA_m"], params["bnA_v"])
    y = cbr(y, params["convB_w"], params["convB_b"],
            params["bnB_g"], params["bnB_b"], params["bnB_m"], params["bnB_v"])
    return jnp.transpose(y, (0, 3, 1, 2))


# ---------------------------------------------------------------------------
# Main
# ---------------------------------------------------------------------------

if __name__ == "__main__":
    # DecoderBlock(in_channels=8, out_channels=8, enc_channels=4)
    N, Cin, Cout, Ce = 2, 8, 8, 4
    H, W = 8, 8                      # x spatial; enc_feat spatial is 2H x 2W

    key = jax.random.PRNGKey(0)
    ks = jax.random.split(key, 16)

    params = {
        # enc_conv: Conv2d(enc_channels, in_channels, 1)  -> (Ce, Cin) + bias
        "enc_w":   0.1 * jax.random.normal(ks[0], (Ce, Cin), jnp.float32),
        "enc_b":   0.1 * jax.random.normal(ks[1], (Cin,), jnp.float32),
        # conv[0]: Conv2d(2*Cin, Cout, 3, padding=1), HWIO weight layout
        "convA_w": 0.1 * jax.random.normal(ks[2], (3, 3, 2 * Cin, Cout), jnp.float32),
        "convA_b": 0.1 * jax.random.normal(ks[3], (Cout,), jnp.float32),
        "bnA_g":   1.0 + 0.1 * jax.random.normal(ks[4], (Cout,), jnp.float32),
        "bnA_b":   0.1 * jax.random.normal(ks[5], (Cout,), jnp.float32),
        "bnA_m":   0.1 * jax.random.normal(ks[6], (Cout,), jnp.float32),
        "bnA_v":   1.0 + 0.1 * jnp.abs(jax.random.normal(ks[7], (Cout,), jnp.float32)),
        # conv[3]: Conv2d(Cout, Cout, 3, padding=1)
        "convB_w": 0.1 * jax.random.normal(ks[8], (3, 3, Cout, Cout), jnp.float32),
        "convB_b": 0.1 * jax.random.normal(ks[9], (Cout,), jnp.float32),
        "bnB_g":   1.0 + 0.1 * jax.random.normal(ks[10], (Cout,), jnp.float32),
        "bnB_b":   0.1 * jax.random.normal(ks[11], (Cout,), jnp.float32),
        "bnB_m":   0.1 * jax.random.normal(ks[12], (Cout,), jnp.float32),
        "bnB_v":   1.0 + 0.1 * jnp.abs(jax.random.normal(ks[13], (Cout,), jnp.float32)),
    }

    x = jax.random.normal(ks[14], (N, Cin, H, W), jnp.float32)
    enc_feat = jax.random.normal(ks[15], (N, Ce, 2 * H, 2 * W), jnp.float32)

    # Generation-appropriate batch handling: single-TC chips (v5e/v6e) fold the
    # batch into the MXU rows (no grid-step overhead); otherwise (v7x: 2 TCs)
    # keep the batch on a "parallel" grid axis so both TensorCores get work.
    try:
        kind = jax.devices()[0].device_kind.lower()
        single_tc = any(s in kind for s in ("v5 lite", "v5e", "v6 lite", "v6e"))
    except Exception:
        single_tc = False
    batch_block = N if single_tc else 1

    fwd = make_decoder_forward(params, H, W, batch_block=batch_block)
    out = jax.block_until_ready(fwd(x, enc_feat))
    assert out.shape == (N, Cout, 2 * H, 2 * W), out.shape

    ref = jax.block_until_ready(reference_forward(x, enc_feat, params))
    # bf16 MXU operands for the heavy Toeplitz dots (f32 accumulation) ->
    # tolerance relaxed accordingly (prologue bilinear/1x1 operators stay f32).
    np.testing.assert_allclose(np.asarray(out), np.asarray(ref),
                               rtol=2e-2, atol=2e-2)

    print("KERNEL_OK")
</pallas_src>

<mosaic_0001>
module attributes {stable_mosaic.version = 11 : i64} {
  func.func @_decoder_kernel(%arg0: i32, %arg1: memref<8x64xf32, #tpu.memory_space<vmem>>, %arg2: memref<16x64xf32, #tpu.memory_space<vmem>>, %arg3: memref<64x128xf32, #tpu.memory_space<vmem>>, %arg4: memref<16x8xf32, #tpu.memory_space<vmem>>, %arg5: memref<64x128xf32, #tpu.memory_space<vmem>>, %arg6: memref<1x128xf32, #tpu.memory_space<vmem>>, %arg7: memref<3x256x128xbf16, #tpu.memory_space<vmem>>, %arg8: memref<3x128x128xbf16, #tpu.memory_space<vmem>>, %arg9: memref<16x16xf32, #tpu.memory_space<vmem>>, %arg10: memref<16x16xf32, #tpu.memory_space<vmem>>, %arg11: memref<1x128xf32, #tpu.memory_space<vmem>>, %arg12: memref<1x128xf32, #tpu.memory_space<vmem>>, %arg13: memref<1x128xf32, #tpu.memory_space<vmem>>, %arg14: memref<1x128xf32, #tpu.memory_space<vmem>>, %arg15: memref<16x128xf32, #tpu.memory_space<vmem>>, %arg16: memref<16x256xbf16, #tpu.memory_space<vmem>>) attributes {dimension_semantics = [#tpu.dimension_semantics<parallel>], iteration_bounds = array<i64: 2>, scalar_prefetch = 0 : i64, scratch_operands = 1 : i64, tpu.core_type = #tpu.core_type<tc>, window_params = [{transform_indices = @transform_0, window_bounds = array<i64: 8, 64>}, {transform_indices = @transform_1, window_bounds = array<i64: 16, 64>}, {pipeline_mode = #tpu.pipeline_mode<synchronous>, transform_indices = @transform_2, window_bounds = array<i64: 64, 128>}, {pipeline_mode = #tpu.pipeline_mode<synchronous>, transform_indices = @transform_3, window_bounds = array<i64: 16, 8>}, {pipeline_mode = #tpu.pipeline_mode<synchronous>, transform_indices = @transform_4, window_bounds = array<i64: 64, 128>}, {pipeline_mode = #tpu.pipeline_mode<synchronous>, transform_indices = @transform_5, window_bounds = array<i64: 1, 128>}, {pipeline_mode = #tpu.pipeline_mode<synchronous>, transform_indices = @transform_6, window_bounds = array<i64: 3, 256, 128>}, {pipeline_mode = #tpu.pipeline_mode<synchronous>, transform_indices = @transform_7, window_bounds = array<i64: 3, 128, 128>}, {pipeline_mode = #tpu.pipeline_mode<synchronous>, transform_indices = @transform_8, window_bounds = array<i64: 16, 16>}, {pipeline_mode = #tpu.pipeline_mode<synchronous>, transform_indices = @transform_9, window_bounds = array<i64: 16, 16>}, {pipeline_mode = #tpu.pipeline_mode<synchronous>, transform_indices = @transform_10, window_bounds = array<i64: 1, 128>}, {pipeline_mode = #tpu.pipeline_mode<synchronous>, transform_indices = @transform_11, window_bounds = array<i64: 1, 128>}, {pipeline_mode = #tpu.pipeline_mode<synchronous>, transform_indices = @transform_12, window_bounds = array<i64: 1, 128>}, {pipeline_mode = #tpu.pipeline_mode<synchronous>, transform_indices = @transform_13, window_bounds = array<i64: 1, 128>}, {transform_indices = @transform_14, window_bounds = array<i64: 16, 128>}]} {
    %c0 = arith.constant 0 : index
    %c0_0 = arith.constant 0 : index
    %0 = vector.load %arg1[%c0, %c0_0] : memref<8x64xf32, #tpu.memory_space<vmem>>, vector<8x64xf32>
    %c0_1 = arith.constant 0 : index
    %c0_2 = arith.constant 0 : index
    %1 = vector.load %arg3[%c0_1, %c0_2] : memref<64x128xf32, #tpu.memory_space<vmem>>, vector<64x128xf32>
    %cst = arith.constant dense<0.000000e+00> : vector<8x128xf32>
    %2 = tpu.matmul %0, %1, %cst {dimension_numbers = #tpu.dot_dimension_numbers<[1], [0], [0], [1], [0, 0, 1, 1], [], []>} : vector<8x64xf32>, vector<64x128xf32>, vector<8x128xf32> -> vector<8x128xf32>
    %c0_3 = arith.constant 0 : index
    %c0_4 = arith.constant 0 : index
    %3 = vector.load %arg4[%c0_3, %c0_4] : memref<16x8xf32, #tpu.memory_space<vmem>>, vector<16x8xf32>
    %cst_5 = arith.constant dense<0.000000e+00> : vector<16x128xf32>
    %4 = tpu.matmul %3, %2, %cst_5 {dimension_numbers = #tpu.dot_dimension_numbers<[1], [0], [0], [1], [0, 0, 1, 1], [], []>} : vector<16x8xf32>, vector<8x128xf32>, vector<16x128xf32> -> vector<16x128xf32>
    %c0_6 = arith.constant 0 : index
    %c0_7 = arith.constant 0 : index
    %5 = vector.load %arg2[%c0_6, %c0_7] : memref<16x64xf32, #tpu.memory_space<vmem>>, vector<16x64xf32>
    %c0_8 = arith.constant 0 : index
    %c0_9 = arith.constant 0 : index
    %6 = vector.load %arg5[%c0_8, %c0_9] : memref<64x128xf32, #tpu.memory_space<vmem>>, vector<64x128xf32>
    %cst_10 = arith.constant dense<0.000000e+00> : vector<16x128xf32>
    %7 = tpu.matmul %5, %6, %cst_10 {dimension_numbers = #tpu.dot_dimension_numbers<[1], [0], [0], [1], [0, 0, 1, 1], [], []>} : vector<16x64xf32>, vector<64x128xf32>, vector<16x128xf32> -> vector<16x128xf32>
    %c0_11 = arith.constant 0 : index
    %c0_12 = arith.constant 0 : index
    %8 = vector.load %arg6[%c0_11, %c0_12] : memref<1x128xf32, #tpu.memory_space<vmem>>, vector<1x128xf32>
    %9 = vector.broadcast %8 : vector<1x128xf32> to vector<16x128xf32>
    %10 = arith.addf %7, %9 : vector<16x128xf32>
    %11 = arith.truncf %4 : vector<16x128xf32> to vector<16x128xbf16>
    %c0_13 = arith.constant 0 : index
    %c0_14 = arith.constant 0 : index
    %12 = vector.load %arg16[%c0_13, %c0_14] : memref<16x256xbf16, #tpu.memory_space<vmem>>, vector<16x128xbf16>
    tpu.vector_store %arg16[%c0_13, %c0_14], %11 {strides = array<i32>} : memref<16x256xbf16, #tpu.memory_space<vmem>>, vector<16x128xbf16>,
    %13 = arith.truncf %10 : vector<16x128xf32> to vector<16x128xbf16>
    %c0_15 = arith.constant 0 : index
    %c128 = arith.constant 128 : index
    %14 = vector.load %arg16[%c0_15, %c128] : memref<16x256xbf16, #tpu.memory_space<vmem>>, vector<16x128xbf16>
    tpu.vector_store %arg16[%c0_15, %c128], %13 {strides = array<i32>} : memref<16x256xbf16, #tpu.memory_space<vmem>>, vector<16x128xbf16>,
    %c0_16 = arith.constant 0 : index
    %c0_17 = arith.constant 0 : index
    %15 = vector.load %arg16[%c0_16, %c0_17] : memref<16x256xbf16, #tpu.memory_space<vmem>>, vector<16x256xbf16>
    %c0_18 = arith.constant 0 : index
    %c0_19 = arith.constant 0 : index
    %c0_20 = arith.constant 0 : index
    %16 = vector.load %arg7[%c0_18, %c0_19, %c0_20] : memref<3x256x128xbf16, #tpu.memory_space<vmem>>, vector<1x256x128xbf16>
    %17 = vector.shape_cast %16 : vector<1x256x128xbf16> to vector<256x128xbf16>
    %cst_21 = arith.constant dense<0.000000e+00> : vector<16x128xf32>
    %18 = tpu.matmul %15, %17, %cst_21 {dimension_numbers = #tpu.dot_dimension_numbers<[1], [0], [0], [1], [0, 0, 1, 1], [], []>} : vector<16x256xbf16>, vector<256x128xbf16>, vector<16x128xf32> -> vector<16x128xf32>
    %c1 = arith.constant 1 : index
    %c0_22 = arith.constant 0 : index
    %c0_23 = arith.constant 0 : index
    %19 = vector.load %arg7[%c1, %c0_22, %c0_23] : memref<3x256x128xbf16, #tpu.memory_space<vmem>>, vector<1x256x128xbf16>
    %20 = vector.shape_cast %19 : vector<1x256x128xbf16> to vector<256x128xbf16>
    %cst_24 = arith.constant dense<0.000000e+00> : vector<16x128xf32>
    %21 = tpu.matmul %15, %20, %cst_24 {dimension_numbers = #tpu.dot_dimension_numbers<[1], [0], [0], [1], [0, 0, 1, 1], [], []>} : vector<16x256xbf16>, vector<256x128xbf16>, vector<16x128xf32> -> vector<16x128xf32>
    %c2 = arith.constant 2 : index
    %c0_25 = arith.constant 0 : index
    %c0_26 = arith.constant 0 : index
    %22 = vector.load %arg7[%c2, %c0_25, %c0_26] : memref<3x256x128xbf16, #tpu.memory_space<vmem>>, vector<1x256x128xbf16>
    %23 = vector.shape_cast %22 : vector<1x256x128xbf16> to vector<256x128xbf16>
    %cst_27 = arith.constant dense<0.000000e+00> : vector<16x128xf32>
    %24 = tpu.matmul %15, %23, %cst_27 {dimension_numbers = #tpu.dot_dimension_numbers<[1], [0], [0], [1], [0, 0, 1, 1], [], []>} : vector<16x256xbf16>, vector<256x128xbf16>, vector<16x128xf32> -> vector<16x128xf32>
    %c0_28 = arith.constant 0 : index
    %c0_29 = arith.constant 0 : index
    %25 = vector.load %arg9[%c0_28, %c0_29] : memref<16x16xf32, #tpu.memory_space<vmem>>, vector<16x16xf32>
    %cst_30 = arith.constant dense<0.000000e+00> : vector<16x128xf32>
    %26 = tpu.matmul %25, %18, %cst_30 {dimension_numbers = #tpu.dot_dimension_numbers<[1], [0], [0], [1], [0, 0, 1, 1], [], []>} : vector<16x16xf32>, vector<16x128xf32>, vector<16x128xf32> -> vector<16x128xf32>
    %27 = arith.addf %21, %26 : vector<16x128xf32>
    %c0_31 = arith.constant 0 : index
    %c0_32 = arith.constant 0 : index
    %28 = vector.load %arg10[%c0_31, %c0_32] : memref<16x16xf32, #tpu.memory_space<vmem>>, vector<16x16xf32>
    %cst_33 = arith.constant dense<0.000000e+00> : vector<16x128xf32>
    %29 = tpu.matmul %28, %24, %cst_33 {dimension_numbers = #tpu.dot_dimension_numbers<[1], [0], [0], [1], [0, 0, 1, 1], [], []>} : vector<16x16xf32>, vector<16x128xf32>, vector<16x128xf32> -> vector<16x128xf32>
    %30 = arith.addf %27, %29 : vector<16x128xf32>
    %c0_34 = arith.constant 0 : index
    %c0_35 = arith.constant 0 : index
    %31 = vector.load %arg11[%c0_34, %c0_35] : memref<1x128xf32, #tpu.memory_space<vmem>>, vector<1x128xf32>
    %32 = vector.broadcast %31 : vector<1x128xf32> to vector<16x128xf32>
    %33 = arith.mulf %30, %32 : vector<16x128xf32>
    %c0_36 = arith.constant 0 : index
    %c0_37 = arith.constant 0 : index
    %34 = vector.load %arg12[%c0_36, %c0_37] : memref<1x128xf32, #tpu.memory_space<vmem>>, vector<1x128xf32>
    %35 = vector.broadcast %34 : vector<1x128xf32> to vector<16x128xf32>
    %36 = arith.addf %33, %35 : vector<16x128xf32>
    %cst_38 = arith.constant 0.000000e+00 : f32
    %37 = vector.broadcast %cst_38 : f32 to vector<16x128xf32>
    %38 = arith.maximumf %36, %37 : vector<16x128xf32>
    %39 = arith.truncf %38 : vector<16x128xf32> to vector<16x128xbf16>
    %c0_39 = arith.constant 0 : index
    %c0_40 = arith.constant 0 : index
    %c0_41 = arith.constant 0 : index
    %40 = vector.load %arg8[%c0_39, %c0_40, %c0_41] : memref<3x128x128xbf16, #tpu.memory_space<vmem>>, vector<1x128x128xbf16>
    %41 = vector.shape_cast %40 : vector<1x128x128xbf16> to vector<128x128xbf16>
    %cst_42 = arith.constant dense<0.000000e+00> : vector<16x128xf32>
    %42 = tpu.matmul %39, %41, %cst_42 {dimension_numbers = #tpu.dot_dimension_numbers<[1], [0], [0], [1], [0, 0, 1, 1], [], []>} : vector<16x128xbf16>, vector<128x128xbf16>, vector<16x128xf32> -> vector<16x128xf32>
    %c1_43 = arith.constant 1 : index
    %c0_44 = arith.constant 0 : index
    %c0_45 = arith.constant 0 : index
    %43 = vector.load %arg8[%c1_43, %c0_44, %c0_45] : memref<3x128x128xbf16, #tpu.memory_space<vmem>>, vector<1x128x128xbf16>
    %44 = vector.shape_cast %43 : vector<1x128x128xbf16> to vector<128x128xbf16>
    %cst_46 = arith.constant dense<0.000000e+00> : vector<16x128xf32>
    %45 = tpu.matmul %39, %44, %cst_46 {dimension_numbers = #tpu.dot_dimension_numbers<[1], [0], [0], [1], [0, 0, 1, 1], [], []>} : vector<16x128xbf16>, vector<128x128xbf16>, vector<16x128xf32> -> vector<16x128xf32>
    %c2_47 = arith.constant 2 : index
    %c0_48 = arith.constant 0 : index
    %c0_49 = arith.constant 0 : index
    %46 = vector.load %arg8[%c2_47, %c0_48, %c0_49] : memref<3x128x128xbf16, #tpu.memory_space<vmem>>, vector<1x128x128xbf16>
    %47 = vector.shape_cast %46 : vector<1x128x128xbf16> to vector<128x128xbf16>
    %cst_50 = arith.constant dense<0.000000e+00> : vector<16x128xf32>
    %48 = tpu.matmul %39, %47, %cst_50 {dimension_numbers = #tpu.dot_dimension_numbers<[1], [0], [0], [1], [0, 0, 1, 1], [], []>} : vector<16x128xbf16>, vector<128x128xbf16>, vector<16x128xf32> -> vector<16x128xf32>
    %c0_51 = arith.constant 0 : index
    %c0_52 = arith.constant 0 : index
    %49 = vector.load %arg9[%c0_51, %c0_52] : memref<16x16xf32, #tpu.memory_space<vmem>>, vector<16x16xf32>
    %cst_53 = arith.constant dense<0.000000e+00> : vector<16x128xf32>
    %50 = tpu.matmul %49, %42, %cst_53 {dimension_numbers = #tpu.dot_dimension_numbers<[1], [0], [0], [1], [0, 0, 1, 1], [], []>} : vector<16x16xf32>, vector<16x128xf32>, vector<16x128xf32> -> vector<16x128xf32>
    %51 = arith.addf %45, %50 : vector<16x128xf32>
    %c0_54 = arith.constant 0 : index
    %c0_55 = arith.constant 0 : index
    %52 = vector.load %arg10[%c0_54, %c0_55] : memref<16x16xf32, #tpu.memory_space<vmem>>, vector<16x16xf32>
    %cst_56 = arith.constant dense<0.000000e+00> : vector<16x128xf32>
    %53 = tpu.matmul %52, %48, %cst_56 {dimension_numbers = #tpu.dot_dimension_numbers<[1], [0], [0], [1], [0, 0, 1, 1], [], []>} : vector<16x16xf32>, vector<16x128xf32>, vector<16x128xf32> -> vector<16x128xf32>
    %54 = arith.addf %51, %53 : vector<16x128xf32>
    %c0_57 = arith.constant 0 : index
    %c0_58 = arith.constant 0 : index
    %55 = vector.load %arg13[%c0_57, %c0_58] : memref<1x128xf32, #tpu.memory_space<vmem>>, vector<1x128xf32>
    %56 = vector.broadcast %55 : vector<1x128xf32> to vector<16x128xf32>
    %57 = arith.mulf %54, %56 : vector<16x128xf32>
    %c0_59 = arith.constant 0 : index
    %c0_60 = arith.constant 0 : index
    %58 = vector.load %arg14[%c0_59, %c0_60] : memref<1x128xf32, #tpu.memory_space<vmem>>, vector<1x128xf32>
    %59 = vector.broadcast %58 : vector<1x128xf32> to vector<16x128xf32>
    %60 = arith.addf %57, %59 : vector<16x128xf32>
    %cst_61 = arith.constant 0.000000e+00 : f32
    %61 = vector.broadcast %cst_61 : f32 to vector<16x128xf32>
    %62 = arith.maximumf %60, %61 : vector<16x128xf32>
    %c0_62 = arith.constant 0 : index
    %c0_63 = arith.constant 0 : index
    %63 = vector.load %arg15[%c0_62, %c0_63] : memref<16x128xf32, #tpu.memory_space<vmem>>, vector<16x128xf32>
    tpu.vector_store %arg15[%c0_62, %c0_63], %62 {strides = array<i32>} : memref<16x128xf32, #tpu.memory_space<vmem>>, vector<16x128xf32>,
    return
  }
  func.func @transform_0(%arg0: i32) -> (i32, i32) {
    %c0_i32 = arith.constant 0 : i32
    %c0_i32_0 = arith.constant 0 : i32
    return %arg0, %c0_i32 : i32, i32
  }
  func.func @transform_1(%arg0: i32) -> (i32, i32) {
    %c0_i32 = arith.constant 0 : i32
    %c0_i32_0 = arith.constant 0 : i32
    return %arg0, %c0_i32 : i32, i32
  }
  func.func @transform_2(%arg0: i32) -> (i32, i32) {
    %c0_i32 = arith.constant 0 : i32
    %c0_i32_0 = arith.constant 0 : i32
    %c0_i32_1 = arith.constant 0 : i32
    return %c0_i32, %c0_i32_0 : i32, i32
  }
  func.func @transform_3(%arg0: i32) -> (i32, i32) {
    %c0_i32 = arith.constant 0 : i32
    %c0_i32_0 = arith.constant 0 : i32
    %c0_i32_1 = arith.constant 0 : i32
    return %c0_i32, %c0_i32_0 : i32, i32
  }
  func.func @transform_4(%arg0: i32) -> (i32, i32) {
    %c0_i32 = arith.constant 0 : i32
    %c0_i32_0 = arith.constant 0 : i32
    %c0_i32_1 = arith.constant 0 : i32
    return %c0_i32, %c0_i32_0 : i32, i32
  }
  func.func @transform_5(%arg0: i32) -> (i32, i32) {
    %c0_i32 = arith.constant 0 : i32
    %c0_i32_0 = arith.constant 0 : i32
    %c0_i32_1 = arith.constant 0 : i32
    return %c0_i32, %c0_i32_0 : i32, i32
  }
  func.func @transform_6(%arg0: i32) -> (i32, i32, i32) {
    %c0_i32 = arith.constant 0 : i32
    %c0_i32_0 = arith.constant 0 : i32
    %c0_i32_1 = arith.constant 0 : i32
    %c0_i32_2 = arith.constant 0 : i32
    return %c0_i32, %c0_i32_0, %c0_i32_1 : i32, i32, i32
  }
  func.func @transform_7(%arg0: i32) -> (i32, i32, i32) {
    %c0_i32 = arith.constant 0 : i32
    %c0_i32_0 = arith.constant 0 : i32
    %c0_i32_1 = arith.constant 0 : i32
    %c0_i32_2 = arith.constant 0 : i32
    return %c0_i32, %c0_i32_0, %c0_i32_1 : i32, i32, i32
  }
  func.func @transform_8(%arg0: i32) -> (i32, i32) {
    %c0_i32 = arith.constant 0 : i32
    %c0_i32_0 = arith.constant 0 : i32
    %c0_i32_1 = arith.constant 0 : i32
    return %c0_i32, %c0_i32_0 : i32, i32
  }
  func.func @transform_9(%arg0: i32) -> (i32, i32) {
    %c0_i32 = arith.constant 0 : i32
    %c0_i32_0 = arith.constant 0 : i32
    %c0_i32_1 = arith.constant 0 : i32
    return %c0_i32, %c0_i32_0 : i32, i32
  }
  func.func @transform_10(%arg0: i32) -> (i32, i32) {
    %c0_i32 = arith.constant 0 : i32
    %c0_i32_0 = arith.constant 0 : i32
    %c0_i32_1 = arith.constant 0 : i32
    return %c0_i32, %c0_i32_0 : i32, i32
  }
  func.func @transform_11(%arg0: i32) -> (i32, i32) {
    %c0_i32 = arith.constant 0 : i32
    %c0_i32_0 = arith.constant 0 : i32
    %c0_i32_1 = arith.constant 0 : i32
    return %c0_i32, %c0_i32_0 : i32, i32
  }
  func.func @transform_12(%arg0: i32) -> (i32, i32) {
    %c0_i32 = arith.constant 0 : i32
    %c0_i32_0 = arith.constant 0 : i32
    %c0_i32_1 = arith.constant 0 : i32
    return %c0_i32, %c0_i32_0 : i32, i32
  }
  func.func @transform_13(%arg0: i32) -> (i32, i32) {
    %c0_i32 = arith.constant 0 : i32
    %c0_i32_0 = arith.constant 0 : i32
    %c0_i32_1 = arith.constant 0 : i32
    return %c0_i32, %c0_i32_0 : i32, i32
  }
  func.func @transform_14(%arg0: i32) -> (i32, i32) {
    %c0_i32 = arith.constant 0 : i32
    %c0_i32_0 = arith.constant 0 : i32
    return %arg0, %c0_i32 : i32, i32
  }
}

</mosaic_0001>

<bundles_post_ra>
// kernel: forward.1
= control target key start
LH: loop header
LB: loop body
LE: loop exit
PB: predicated region body
PF: predicated region fallthrough
CT: control target
= control target key end

     0   :  { %s2695_s29 = smov 0   ;;  %s3085_s0 = inlined_call_operand.vmem [shape: f32[16,64], index: 0, kind: input, shape index: {}]   ;;  %s3086_s1 = inlined_call_operand.vmem [shape: f32[32,64], index: 1, kind: input, shape index: {}]   ;;  %s3087_s2 = inlined_call_operand.vmem [shape: f32[64,128], index: 2, kind: input, shape index: {}]   ;;  %s3088_s3 = inlined_call_operand.vmem [shape: f32[16,8], index: 3, kind: input, shape index: {}]   ;;  %s3089_s4 = inlined_call_operand.vmem [shape: f32[64,128], index: 4, kind: input, shape index: {}]   ;;  %s3090_s5 = inlined_call_operand.vmem [shape: f32[1,128], index: 5, kind: input, shape index: {}]   ;;  %s3091_s6 = inlined_call_operand.vmem [shape: bf16[3,256,128], index: 6, kind: input, shape index: {}]   ;;  %s3092_s7 = inlined_call_operand.vmem [shape: bf16[3,128,128], index: 7, kind: input, shape index: {}]   ;;  %s3093_s8 = inlined_call_operand.vmem [shape: f32[16,16], index: 8, kind: input, shape index: {}]   ;;  %s3094_s9 = inlined_call_operand.vmem [shape: f32[16,16], index: 9, kind: input, shape index: {}]   ;;  %s3095_s10 = inlined_call_operand.vmem [shape: f32[1,128], index: 10, kind: input, shape index: {}]   ;;  %s3096_s11 = inlined_call_operand.vmem [shape: f32[1,128], index: 11, kind: input, shape index: {}]   ;;  %s3097_s12 = inlined_call_operand.vmem [shape: f32[1,128], index: 12, kind: input, shape index: {}]   ;;  %s3098_s13 = inlined_call_operand.vmem [shape: f32[1,128], index: 13, kind: input, shape index: {}]   ;;  %s3099_s14 = inlined_call_operand.vmem [shape: f32[32,128], index: 14, kind: output, shape index: {}]  }
   0x1 LB: > { %s2701_s30 = sadd.s32 4294967295, %s2615_s29   ;;  %p2022_p0 = scmp.ge.s32.totalorder %s2615_s29, 1  ;;  %s2615_s29 = sphi %s2695_s29, %s24_s29  }
   0x2   : > { %p422_p1 = scmp.lt.s32.totalorder %s2615_s29, 3 }
   0x4   : > { %p423_p2 = pnand %p2022_p0, %p422_p1 }
   0x5   : > { %v490_v0 = vld [vmem:[%s3087_s2] sm:$0xff] (!%p423_p2)  ;;  %v491_v1 = vld [vmem:[%s3087_s2 + $0x8] sm:$0xff] (!%p423_p2)  ;;  %v492_v2 = vld [vmem:[%s3087_s2 + $0x10] sm:$0xff] (!%p423_p2)  ;;  %v2617_v3 = vmov (!%p423_p2), 0.0|0.0   ;;  %vm2618_vm0 = vmmov (!%p423_p2), 0   ;;  %v2619_v6 = vmov (!%p423_p2), 0.0  }
   0x6   : > { %426 = sbr.rel (%p423_p2) target bundleno = 1371 (0x55b), region = 76  ;;  %2478 = vmatprep.subr.bf16.mxu0 (!%p423_p2), %v2617_v3  ;;  %v2479_v4 = vpack.c.bf16 (!%p423_p2), %v491_v1, %v490_v0  ;;  %v493_v5 = vld [vmem:[%s3087_s2 + $0x18] sm:$0xff] (!%p423_p2)  ;;  %2363 = vmatprep.mubr.msk.f32.mxu0 (!%p423_p2), %vm2618_vm0, %v2619_v6  ;;  %p472_p3 = scmp.lt.s32.totalorder (!%p423_p2), %s2701_s30, 1  ;;  %v494_v7 = vld [vmem:[%s3087_s2 + $0x20] sm:$0xff] (!%p423_p2)  ;;  %v495_v9 = vld [vmem:[%s3087_s2 + $0x28] sm:$0xff] (!%p423_p2)  ;;  %vm498_vm1 = vcmask (!%p423_p2), 523264  }
   0x7   : > { %v2482_v8 = vpack.c.bf16 (!%p423_p2), %v493_v5, %v492_v2  ;;  %v496_v10 = vld [vmem:[%s3087_s2 + $0x30] sm:$0xff] (!%p423_p2)  ;;  %v2485_v11 = vpack.c.bf16 (!%p423_p2), %v495_v9, %v494_v7  ;;  %v497_v12 = vld [vmem:[%s3087_s2 + $0x38] sm:$0xff] (!%p423_p2)  ;;  %v572_v15 = vld [vmem:[%s3088_s3] sm:$0xff] (!%p423_p2)  ;;  %vm574_vm2 = vcmask (!%p423_p2), 64512   ;;  %s2024_s20 = sshll.u32 (!%p423_p2), %s2701_s30, 1  ;;  %vm1134_vm3 = vcmask (!%p423_p2), 130048  }
   0x8   : > { %2480 = vmatpush3.bf16.msra.mxu0 (!%p423_p2), %v2479_v4  ;;  %v2488_v13 = vpack.c.bf16 (!%p423_p2), %v497_v12, %v496_v10  ;;  %2368 = vmatprep.mubr.msk.f32.mxu1 (!%p423_p2), %vm574_vm2, %v572_v15  ;;  %v2538_v16 = vld [vmem:[%s3091_s6 + $0x40] sm:$0xff] (!%p423_p2)   ;;  %v2542_v18 = vld [vmem:[%s3091_s6 + $0x48] sm:$0xff] (!%p423_p2)   ;;  %v2546_v20 = vld [vmem:[%s3091_s6 + $0x50] sm:$0xff] (!%p423_p2)   ;;  %p477_p4 = scmp.lt.s32.totalorder (!%p423_p2), %s2024_s20, 3 }
   0x9   : > { %2481 = vmatprep.subr.bf16.mxu0 (!%p423_p2), %v2617_v3  ;;  %v2540_v17 = vld [vmem:[%s3091_s6] sm:$0xff] (!%p423_p2)   ;;  %v2544_v19 = vld [vmem:[%s3091_s6 + $0x8] sm:$0xff] (!%p423_p2)   ;;  %v660_v23 = vld [vmem:[%s3089_s4 + $0x10] sm:$0xff] (!%p423_p2) }
   0xa   : > { %v658_v21 = vld [vmem:[%s3089_s4] sm:$0xff] (!%p423_p2)  ;;  %v659_v22 = vld [vmem:[%s3089_s4 + $0x8] sm:$0xff] (!%p423_p2)  ;;  %v661_v24 = vld [vmem:[%s3089_s4 + $0x18] sm:$0xff] (!%p423_p2) }
   0xb   : > { %v2490_v25 = vpack.c.bf16 (!%p423_p2), %v659_v22, %v658_v21  ;;  %v573_v27 = vld [vmem:[%s3088_s3 + $0x8] sm:$0xff] (!%p423_p2)  ;;  %v2494_v29 = vpack.c.bf16 (!%p423_p2), %v661_v24, %v660_v23  ;;  %v662_v31 = vld [vmem:[%s3089_s4 + $0x20] sm:$0xff] (!%p423_p2)  ;;  %v664_v34 = vld [vmem:[%s3089_s4 + $0x30] sm:$0xff] (!%p423_p2) }
   0xc   : > { %2483 = vmatpush3.bf16.msra.mxu0 (!%p423_p2), %v2482_v8  ;;  %v663_v32 = vld [vmem:[%s3089_s4 + $0x28] sm:$0xff] (!%p423_p2)  ;;  %v665_v35 = vld [vmem:[%s3089_s4 + $0x38] sm:$0xff] (!%p423_p2)  ;;  %v2537_v37 = vld [vmem:[%s3091_s6 + $0x140] sm:$0xff] (!%p423_p2)  }
   0xd   : > { %s473_s27 = scalar_select %p472_p3, %s2701_s30, 1  ;;  %2484 = vmatprep.subr.bf16.mxu0 %v2617_v3  ;;  %v2498_v33 = vpack.c.bf16 %v663_v32, %v662_v31  ;;  %v2502_v36 = vpack.c.bf16 %v665_v35, %v664_v34  ;;  %v2539_v39 = vld [vmem:[%s3091_s6 + $0x100] sm:$0xff]   ;;  %v2541_v40 = vld [vmem:[%s3091_s6 + $0x148] sm:$0xff]   ;;  %v2545_v42 = vld [vmem:[%s3091_s6 + $0x150] sm:$0xff]  }
   0xe   : > { %s3101_s20 = smov (!%p477_p4, %s2024_s20), 3  ;;  %v2543_v41 = vld [vmem:[%s3091_s6 + $0x108] sm:$0xff]   ;;  %v2547_v43 = vld [vmem:[%s3091_s6 + $0x110] sm:$0xff]   ;;  %v2549_v45 = vld [vmem:[%s3091_s6 + $0x158] sm:$0xff]  }
   0xf   : > { %s2023_s18 = sshll.u32 %s473_s27, 3  ;;  %v2548_v44 = vld [vmem:[%s3091_s6 + $0x10] sm:$0xff]   ;;  %v2550_v46 = vld [vmem:[%s3091_s6 + $0x58] sm:$0xff]   ;;  %v2553_v49 = vld [vmem:[%s3091_s6 + $0x160] sm:$0xff]  }
  0x10   : > { %s475_s21 = scalar_lea.vmem %s3085_s0, %s2023_s18  ;;  %2486 = vmatpush3.bf16.msra.mxu0 %v2485_v11  ;;  %v2551_v47 = vld [vmem:[%s3091_s6 + $0x118] sm:$0xff]   ;;  %v2554_v50 = vld [vmem:[%s3091_s6 + $0x60] sm:$0xff]   ;;  %v2557_v53 = vld [vmem:[%s3091_s6 + $0x168] sm:$0xff]  }
  0x11   : > { %2487 = vmatprep.subr.bf16.mxu0 %v2617_v3  ;;  %v489_v14 = vld [vmem:[%s475_s21] sm:$0xff]  ;;  %s2025_s21 = sshll.u32 %s3101_s20, 3  ;;  %v2552_v48 = vld [vmem:[%s3091_s6 + $0x18] sm:$0xff]   ;;  %v2558_v54 = vld [vmem:[%s3091_s6 + $0x68] sm:$0xff]  }
  0x12   : > { %s480_s17 = scalar_lea.vmem %s3086_s1, %s2025_s21  ;;  %v2555_v51 = vld [vmem:[%s3091_s6 + $0x120] sm:$0xff]   ;;  %v2559_v55 = vld [vmem:[%s3091_s6 + $0x128] sm:$0xff]   ;;  %v2561_v57 = vld [vmem:[%s3091_s6 + $0x170] sm:$0xff]   ;;  %s486_s28 = scalar_lea.vmem %s3099_s14, %s2025_s21 }
  0x13   : > { %v656_v30 = vld [vmem:[%s480_s17] sm:$0xff]  ;;  %v657_v38 = vld [vmem:[%s480_s17 + $0x8] sm:$0xff]  ;;  %v2562_v58 = vld [vmem:[%s3091_s6 + $0x70] sm:$0xff]  }
  0x14   : > { %2489 = vmatpush3.bf16.msra.mxu0 %v2488_v13  ;;  %v2556_v52 = vld [vmem:[%s3091_s6 + $0x20] sm:$0xff]   ;;  %v2560_v56 = vld [vmem:[%s3091_s6 + $0x28] sm:$0xff]   ;;  %v2563_v59 = vld [vmem:[%s3091_s6 + $0x130] sm:$0xff]  }
  0x15   : > { %2238 = vmatprep.subr.bf16.mxu0 %v2538_v16  ;;  %v2564_v60 = vld [vmem:[%s3091_s6 + $0x30] sm:$0xff]   ;;  %v2565_v61 = vld [vmem:[%s3091_s6 + $0x178] sm:$0xff]   ;;  %v2569_v1 = vld [vmem:[%s3091_s6 + $0xc0] sm:$0xff]  }
  0x16   : > { %v2566_v62 = vld [vmem:[%s3091_s6 + $0x78] sm:$0xff]   ;;  %v2031_v5 = vld [vmem:[%s3090_s5] ss:$0 sm:$0xff]  ;;  %v2571_v13 = vld [vmem:[%s3091_s6 + $0xc8] sm:$0xff]  }
  0x17   : > { %2364 = vmatmul.mubr.msk.f32.vlgmr.msra.gmra.mrb[0].mxu0 %vm498_vm1, %v489_v14  ;;  %v2567_v63 = vld [vmem:[%s3091_s6 + $0x138] sm:$0xff]   ;;  %v2570_v12 = vld [vmem:[%s3091_s6 + $0x80] sm:$0xff]   ;;  %v2572_v14 = vld [vmem:[%s3091_s6 + $0x88] sm:$0xff]  }
  0x18   : > { %2239 = vmatpush3.bf16.msra.mxu0 %v2540_v17  ;;  %v2568_v0 = vld [vmem:[%s3091_s6 + $0x38] sm:$0xff]   ;;  %v2573_v15 = vld [vmem:[%s3091_s6 + $0xd0] sm:$0xff]   ;;  %v2579_v21 = vld [vmem:[%s3091_s6 + $0xe8] sm:$0xff]  }
  0x19   : > { %2240 = vmatprep.subr.bf16.mxu0 %v2542_v18  ;;  %v2574_v16 = vld [vmem:[%s3091_s6 + $0x90] sm:$0xff]   ;;  %v2575_v17 = vld [vmem:[%s3091_s6 + $0xd8] sm:$0xff]   ;;  %v2580_v22 = vld [vmem:[%s3091_s6 + $0xa8] sm:$0xff]  }
  0x1a   : > { %v2576_v18 = vld [vmem:[%s3091_s6 + $0x98] sm:$0xff]   ;;  %v2581_v23 = vld [vmem:[%s3091_s6 + $0xf0] sm:$0xff]   ;;  %v2594_v32 = vld [vmem:[%s3092_s7 + $0xa0] sm:$0xff]  }
  0x1b   : > { %v2582_v24 = vld [vmem:[%s3091_s6 + $0xb0] sm:$0xff]   ;;  %v2592_v31 = vld [vmem:[%s3092_s7 + $0x98] sm:$0xff]  }
  0x1c   : > { %2241 = vmatpush3.bf16.msra.mxu0 %v2544_v19  ;;  %v2577_v19 = vld [vmem:[%s3091_s6 + $0xe0] sm:$0xff]  }
  0x1d   : > { %2242 = vmatprep.subr.bf16.mxu0 %v2546_v20  ;;  %v2578_v20 = vld [vmem:[%s3091_s6 + $0xa0] sm:$0xff]  }
  0x20   : > { %2243 = vmatpush3.bf16.msra.mxu0 %v2548_v44 }
  0x21   : > { %2244 = vmatprep.subr.bf16.mxu0 %v2550_v46 }
  0x24   : > { %2245 = vmatpush3.bf16.msra.mxu0 %v2552_v48  ;;  %v2965_v48 = vld [vmem:[%s3094_s9] sm:$0xff] }
  0x25   : > { %2246 = vmatprep.subr.bf16.mxu0 %v2554_v50  ;;  %v2585_v50 = vld [vmem:[%s3092_s7] sm:$0xff]  }
  0x28   : > { %2247 = vmatpush3.bf16.msra.mxu0 %v2556_v52  ;;  %v2589_v52 = vld [vmem:[%s3092_s7 + $0x10] sm:$0xff]  }
  0x29   : > { %2248 = vmatprep.subr.bf16.mxu0 %v2558_v54 }
  0x2c   : > { %2249 = vmatpush3.bf16.msra.mxu0 %v2560_v56  ;;  %v2593_v56 = vld [vmem:[%s3092_s7 + $0x20] sm:$0xff]  }
  0x2d   : > { %2250 = vmatprep.subr.bf16.mxu0 %v2562_v58 }
  0x30   : > { %2251 = vmatpush3.bf16.msra.mxu0 %v2564_v60 }
  0x31   : > { %2252 = vmatprep.subr.bf16.mxu0 %v2566_v62  ;;  %v2596_v62 = vld [vmem:[%s3092_s7 + $0xa8] sm:$0xff]  }
  0x34   : > { %2253 = vmatpush3.bf16.msra.mxu0 %v2568_v0  ;;  %v2598_v0 = vld [vmem:[%s3092_s7 + $0xb0] sm:$0xff]  }
  0xea   : > { %v568_v26 = vpop.f32.mrb[0].mxu0 }
  0xeb   : > { %v2365_v28 = vpop.f32.mrb[1].mxu0  ;;  %2366 = vmatprep.subr.mxu1 %v568_v26 }
  0xec   : > { %2367 = vmatpush3.msra.mxu1 %v568_v26  ;;  %v2584_v26 = vld [vmem:[%s3091_s6 + $0xb8] sm:$0xff]   ;;  %v2586_v28 = vld [vmem:[%s3092_s7 + $0x80] sm:$0xff]  }
  0xed   : > { %2369 = vmatmul.mubr.msk.f32.vlgmr.msra.gmra.mrb[0].mxu1 %vm574_vm2, %v573_v27  ;;  %2491 = vmatprep.subr.bf16.mxu1 %v2490_v25  ;;  %v2933_v27 = vld [vmem:[%s3093_s8] sm:$0xff] }
  0xee   : > { %2493 = vmatpush3.bf16.msra.mxu1 %v2490_v25  ;;  %2387 = vmatprep.mubr.msk.f32.mxu1 %vm498_vm1, %v656_v30  ;;  %v2583_v25 = vld [vmem:[%s3091_s6 + $0xf8] sm:$0xff]   ;;  %v2590_v30 = vld [vmem:[%s3092_s7 + $0x90] sm:$0xff]  }
  0xef   : > { %2495 = vmatprep.subr.bf16.mxu1 %v2494_v29 }
  0xf2   : > { %2497 = vmatpush3.bf16.msra.mxu1 %v2494_v29  ;;  %v2588_v29 = vld [vmem:[%s3092_s7 + $0x88] sm:$0xff]  }
  0xf3   : > { %2499 = vmatprep.subr.bf16.mxu1 %v2498_v33 }
  0xf6   : > { %2501 = vmatpush3.bf16.msra.mxu1 %v2498_v33 }
  0xf7   : > { %2503 = vmatprep.subr.bf16.mxu1 %v2502_v36 }
  0xfa   : > { %2505 = vmatpush3.bf16.msra.mxu1 %v2502_v36 }
  0xfb   : > { %2260 = vmatprep.subr.bf16.mxu1 %v2537_v37 }
  0xfd   : > { %2388 = vmatmul.mubr.msk.f32.vlgmr.msra.gmra.mrb[2].mxu1 %vm498_vm1, %v657_v38 }
  0xfe   : > { %2261 = vmatpush3.bf16.msra.mxu1 %v2539_v39 }
  0xff   : > { %2262 = vmatprep.subr.bf16.mxu1 %v2541_v40 }
 0x102   : > { %2263 = vmatpush3.bf16.msra.mxu1 %v2543_v41 }
 0x103   : > { %2264 = vmatprep.subr.bf16.mxu1 %v2545_v42 }
 0x106   : > { %2265 = vmatpush3.bf16.msra.mxu1 %v2547_v43 }
 0x107   : > { %2266 = vmatprep.subr.bf16.mxu1 %v2549_v45 }
 0x10a   : > { %2267 = vmatpush3.bf16.msra.mxu1 %v2551_v47  ;;  %v2960_v47 = vld [vmem:[%s3093_s8 + $0x8] sm:$0xff] }
 0x10b   : > { %2268 = vmatprep.subr.bf16.mxu1 %v2553_v49  ;;  %v2975_v49 = vld [vmem:[%s3094_s9 + $0x8] sm:$0xff] }
 0x10e   : > { %2269 = vmatpush3.bf16.msra.mxu1 %v2555_v51  ;;  %v2587_v51 = vld [vmem:[%s3092_s7 + $0x8] sm:$0xff]  }
 0x10f   : > { %2270 = vmatprep.subr.bf16.mxu1 %v2557_v53  ;;  %v2591_v53 = vld [vmem:[%s3092_s7 + $0x18] sm:$0xff]  }
 0x112   : > { %2271 = vmatpush3.bf16.msra.mxu1 %v2559_v55 }
 0x113   : > { %2272 = vmatprep.subr.bf16.mxu1 %v2561_v57 }
 0x116   : > { %2273 = vmatpush3.bf16.msra.mxu1 %v2563_v59 }
 0x117   : > { %2274 = vmatprep.subr.bf16.mxu1 %v2565_v61  ;;  %v2595_v61 = vld [vmem:[%s3092_s7 + $0x28] sm:$0xff]  }
 0x11a   : > { %2275 = vmatpush3.bf16.msra.mxu1 %v2567_v63  ;;  %v2597_v63 = vld [vmem:[%s3092_s7 + $0x30] sm:$0xff]  }
 0x11b   : > { %2286 = vmatprep.subr.bf16.mxu1 %v2569_v1  ;;  %v2599_v1 = vld [vmem:[%s3092_s7 + $0x38] sm:$0xff]  }
 0x1c0   : > { %v2370_v2 = vpop.f32.mrb[0].mxu1 }
 0x1c1   : > { %v647_v3 = vpop.f32.mrb[1].mxu1 }
 0x1c2   : > { %v754_v4 = vpack.c.bf16 %v2370_v2, %v647_v3  ;;  %v2600_v2 = vld [vmem:[%s3092_s7 + $0xb8] sm:$0xff]  }
 0x1d0   : > { %v2389_v7 = vpop.f32.mrb[2].mxu1 }
 0x1d1   : > { %v751_v8 = vadd.f32 %v2389_v7, %v2031_v5  ;;  %v745_v9 = vpop.f32.mrb[3].mxu1 }
 0x1d2   : > { %v746_v10 = vadd.f32 %v2031_v5, %v745_v9 }
 0x1d4   : > { %v756_v11 = vpack.c.bf16 %v751_v8, %v746_v10  ;;  %v2151_v8 = vld [vmem:[%s3096_s11] ss:$0 sm:$0xff] }
 0x1d6   : > { %920 = vmatprep.mubr.bf16.mxu0 %v756_v11  ;;  %1123 = vmatprep.mubr.bf16.mxu1 %v756_v11 }
 0x1d7   : > { %921 = vmatmul.mubr.bf16.vlgmr.msra.gmra.mrb[4].mxu0 %v754_v4  ;;  %1124 = vmatmul.mubr.bf16.vlgmr.msra.gmra.mrb[4].mxu1 %v754_v4 }
 0x1d8   : > { %2287 = vmatpush3.bf16.msra.mxu1 %v2570_v12  ;;  %1344 = vmatprep.mubr.bf16.mxu1 %v756_v11 }
 0x1d9   : > { %2288 = vmatprep.subr.bf16.mxu1 %v2571_v13  ;;  %2394 = vmatprep.mubr.msk.f32.mxu0 %vm1134_vm3, %v2933_v27 }
 0x1dc   : > { %2289 = vmatpush3.bf16.msra.mxu1 %v2572_v14 }
 0x1dd   : > { %2290 = vmatprep.subr.bf16.mxu1 %v2573_v15 }
 0x1e0   : > { %2291 = vmatpush3.bf16.msra.mxu1 %v2574_v16  ;;  %v2601_v16 = vld [vmem:[%s3092_s7 + $0x40] sm:$0xff]  }
 0x1e1   : > { %2292 = vmatprep.subr.bf16.mxu1 %v2575_v17 }
 0x1e4   : > { %2293 = vmatpush3.bf16.msra.mxu1 %v2576_v18  ;;  %v2602_v18 = vld [vmem:[%s3092_s7 + $0x48] sm:$0xff]  }
 0x1e5   : > { %2294 = vmatprep.subr.bf16.mxu1 %v2577_v19  ;;  %v2603_v19 = vld [vmem:[%s3092_s7 + $0x50] sm:$0xff]  }
 0x1e8   : > { %2295 = vmatpush3.bf16.msra.mxu1 %v2578_v20  ;;  %v2604_v20 = vld [vmem:[%s3092_s7 + $0x58] sm:$0xff]  }
 0x1e9   : > { %2296 = vmatprep.subr.bf16.mxu1 %v2579_v21  ;;  %v2605_v21 = vld [vmem:[%s3092_s7 + $0x60] sm:$0xff]  }
 0x1ec   : > { %2297 = vmatpush3.bf16.msra.mxu1 %v2580_v22  ;;  %v2606_v22 = vld [vmem:[%s3092_s7 + $0x68] sm:$0xff]  }
 0x1ed   : > { %2298 = vmatprep.subr.bf16.mxu1 %v2581_v23  ;;  %v2607_v23 = vld [vmem:[%s3092_s7 + $0x70] sm:$0xff]  }
 0x1f0   : > { %2299 = vmatpush3.bf16.msra.mxu1 %v2582_v24  ;;  %v2608_v24 = vld [vmem:[%s3092_s7 + $0x78] sm:$0xff]  }
 0x1f1   : > { %2300 = vmatprep.subr.bf16.mxu1 %v2583_v25 }
 0x1f4   : > { %2301 = vmatpush3.bf16.msra.mxu1 %v2584_v26 }
 0x1f5   : > { %2424 = vmatprep.subr.bf16.mxu1 %v2619_v6 }
 0x1f7   : > { %1345 = vmatmul.mubr.bf16.vlgmr.msra.gmra.mrb[8].mxu1 %v754_v4  ;;  %v2150_v4 = vld [vmem:[%s3095_s10] ss:$0 sm:$0xff] }
 0x1f8   : > { %2440 = vmatprep.mubr.msk.bf16.mxu1 %vm2618_vm0, %v2619_v6  ;;  %2425 = vmatpush3.bf16.msra.mxu1 %v2586_v28 }
 0x1f9   : > { %2426 = vmatprep.subr.bf16.mxu1 %v2619_v6 }
 0x1fc   : > { %2427 = vmatpush3.bf16.msra.mxu1 %v2588_v29 }
 0x1fd   : > { %2428 = vmatprep.subr.bf16.mxu1 %v2619_v6 }
 0x200   : > { %2429 = vmatpush3.bf16.msra.mxu1 %v2590_v30 }
 0x201   : > { %2430 = vmatprep.subr.bf16.mxu1 %v2619_v6 }
 0x204   : > { %2431 = vmatpush3.bf16.msra.mxu1 %v2592_v31 }
 0x205   : > { %2432 = vmatprep.subr.bf16.mxu1 %v2619_v6 }
 0x208   : > { %2433 = vmatpush3.bf16.msra.mxu1 %v2594_v32 }
 0x209   : > { %2434 = vmatprep.subr.bf16.mxu1 %v2619_v6 }
 0x20c   : > { %2435 = vmatpush3.bf16.msra.mxu1 %v2596_v62 }
 0x20d   : > { %2436 = vmatprep.subr.bf16.mxu1 %v2619_v6 }
 0x210   : > { %2437 = vmatpush3.bf16.msra.mxu1 %v2598_v0 }
 0x211   : > { %2438 = vmatprep.subr.bf16.mxu1 %v2619_v6 }
 0x214   : > { %2439 = vmatpush3.bf16.msra.mxu1 %v2600_v2 }
 0x2aa   : > { %v2254_v33 = vpop.f32.mrb[4].mxu0  ;;  %v2276_v34 = vpop.f32.mrb[4].mxu1 }
 0x2ab   : > { %v2255_v35 = vpop.f32.mrb[5].mxu0  ;;  %v2277_v36 = vpop.f32.mrb[5].mxu1 }
 0x2ac   : > { %v2256_v37 = vadd.f32 %v2255_v35, %v2254_v33  ;;  %v2278_v38 = vadd.f32 %v2277_v36, %v2276_v34  ;;  %v2257_v39 = vpop.f32.mrb[6].mxu0  ;;  %v2279_v40 = vpop.f32.mrb[6].mxu1 }
 0x2ad   : > { %v2258_v41 = vpop.f32.mrb[7].mxu0  ;;  %v2280_v42 = vpop.f32.mrb[7].mxu1 }
 0x2ae   : > { %v2259_v43 = vadd.f32 %v2258_v41, %v2257_v39  ;;  %v2281_v44 = vadd.f32 %v2280_v42, %v2279_v40 }
 0x2b0   : > { %v2506_v45 = vpack.c.bf16 %v2259_v43, %v2256_v37  ;;  %v2510_v46 = vpack.c.bf16 %v2281_v44, %v2278_v38  ;;  %v2212_v43 = vld [vmem:[%s3097_s12] ss:$0 sm:$0xff] }
 0x2b2   : > { %2507 = vmatprep.subr.bf16.mxu0 %v2506_v45 }
 0x2b3   : > { %2509 = vmatpush3.bf16.msra.mxu0 %v2506_v45 }
 0x2b4   : > { %2511 = vmatprep.subr.bf16.mxu0 %v2510_v46 }
 0x2b6   : > { %2395 = vmatmul.mubr.msk.f32.vlgmr.msra.gmra.mrb[2].mxu0 %vm1134_vm3, %v2960_v47 }
 0x2b7   : > { %2513 = vmatpush3.bf16.msra.mxu0 %v2510_v46  ;;  %2401 = vmatprep.mubr.msk.f32.mxu0 %vm1134_vm3, %v2965_v48  ;;  %v2213_v46 = vld [vmem:[%s3098_s13] ss:$0 sm:$0xff] }
 0x2b8   : > { %2404 = vmatprep.subr.bf16.mxu0 %v2619_v6 }
 0x2be   : > { %2402 = vmatmul.mubr.msk.f32.vlgmr.msra.gmra.mrb[2].mxu0 %vm1134_vm3, %v2975_v49 }
 0x2bf   : > { %2405 = vmatpush3.bf16.msra.mxu0 %v2585_v50  ;;  %2420 = vmatprep.mubr.msk.bf16.mxu0 %vm2618_vm0, %v2619_v6 }
 0x2c0   : > { %2406 = vmatprep.subr.bf16.mxu0 %v2619_v6 }
 0x2c3   : > { %2407 = vmatpush3.bf16.msra.mxu0 %v2587_v51 }
 0x2c4   : > { %2408 = vmatprep.subr.bf16.mxu0 %v2619_v6 }
 0x2c7   : > { %2409 = vmatpush3.bf16.msra.mxu0 %v2589_v52 }
 0x2c8   : > { %2410 = vmatprep.subr.bf16.mxu0 %v2619_v6 }
 0x2ca   : > { %v2302_v54 = vpop.f32.mrb[8].mxu1 }
 0x2cb   : > { %v2303_v55 = vpop.f32.mrb[9].mxu1  ;;  %2411 = vmatpush3.bf16.msra.mxu0 %v2591_v53 }
 0x2cc   : > { %v2304_v57 = vadd.f32 %v2303_v55, %v2302_v54  ;;  %v2305_v58 = vpop.f32.mrb[10].mxu1  ;;  %2412 = vmatprep.subr.bf16.mxu0 %v2619_v6 }
 0x2cd   : > { %v2306_v59 = vpop.f32.mrb[11].mxu1 }
 0x2ce   : > { %v2307_v60 = vadd.f32 %v2306_v59, %v2305_v58 }
 0x2cf   : > { %2413 = vmatpush3.bf16.msra.mxu0 %v2593_v56 }
 0x2d0   : > { %2414 = vmatprep.subr.bf16.mxu0 %v2619_v6 }
 0x2d3   : > { %2415 = vmatpush3.bf16.msra.mxu0 %v2595_v61 }
 0x2d4   : > { %2416 = vmatprep.subr.bf16.mxu0 %v2619_v6 }
 0x2d7   : > { %2417 = vmatpush3.bf16.msra.mxu0 %v2597_v63 }
 0x2d8   : > { %2418 = vmatprep.subr.bf16.mxu0 %v2619_v6 }
 0x2db   : > { %2419 = vmatpush3.bf16.msra.mxu0 %v2599_v1 }
 0x2dc   : > { %2451 = vmatprep.subr.bf16.mxu0 %v2619_v6 }
 0x391   : > { %v2403_v3 = vpop.f32.mrb[2].mxu0 }
 0x392   : > { %v2522_v5 = vadd.f32 %v2403_v3, %v2307_v60  ;;  %v1427_v7 = vpop.f32.mrb[3].mxu0 }
 0x393   : > { %v2523_v9 = vadd.f32 %v2304_v57, %v1427_v7 }
 0x394   : > { %v1446_v10 = vmul.f32 %v2522_v5, %v2150_v4 }
 0x395   : > { %v1445_v11 = vmul.f32 %v2523_v9, %v2150_v4 }
 0x396   : > { %v1455_v12 = vadd.f32 %v2151_v8, %v1446_v10 }
 0x397   : > { %v1454_v13 = vadd.f32 %v2151_v8, %v1445_v11 }
 0x398   : > { %v1457_v14 = vmax.f32 %v1455_v12, 0.0 }
 0x399   : > { %v1456_v15 = vmax.f32 %v1454_v13, 0.0 }
 0x39b   : > { %v1458_v17 = vpack.c.bf16 %v1457_v14, %v1456_v15 }
 0x39d   : > { %2421 = vmatmul.mubr.bf16.vlgmr.msra.gmra.mrb[8].mxu0 %v1458_v17  ;;  %2441 = vmatmul.mubr.bf16.vlgmr.msra.gmra.mrb[12].mxu1 %v1458_v17 }
 0x39e   : > { %2452 = vmatpush3.bf16.msra.mxu0 %v2601_v16  ;;  %2467 = vmatprep.mubr.msk.bf16.mxu0 %vm2618_vm0, %v2619_v6 }
 0x39f   : > { %2453 = vmatprep.subr.bf16.mxu0 %v2619_v6  ;;  %2448 = vmatprep.mubr.msk.f32.mxu1 %vm1134_vm3, %v2933_v27 }
 0x3a2   : > { %2454 = vmatpush3.bf16.msra.mxu0 %v2602_v18 }
 0x3a3   : > { %2455 = vmatprep.subr.bf16.mxu0 %v2619_v6 }
 0x3a6   : > { %2456 = vmatpush3.bf16.msra.mxu0 %v2603_v19 }
 0x3a7   : > { %2457 = vmatprep.subr.bf16.mxu0 %v2619_v6 }
 0x3aa   : > { %2458 = vmatpush3.bf16.msra.mxu0 %v2604_v20 }
 0x3ab   : > { %2459 = vmatprep.subr.bf16.mxu0 %v2619_v6 }
 0x3ae   : > { %2460 = vmatpush3.bf16.msra.mxu0 %v2605_v21 }
 0x3af   : > { %2461 = vmatprep.subr.bf16.mxu0 %v2619_v6 }
 0x3b2   : > { %2462 = vmatpush3.bf16.msra.mxu0 %v2606_v22 }
 0x3b3   : > { %2463 = vmatprep.subr.bf16.mxu0 %v2619_v6 }
 0x3b6   : > { %2464 = vmatpush3.bf16.msra.mxu0 %v2607_v23 }
 0x3b7   : > { %2465 = vmatprep.subr.bf16.mxu0 %v2619_v6 }
 0x3ba   : > { %2466 = vmatpush3.bf16.msra.mxu0 %v2608_v24 }
 0x3bd   : > { %2468 = vmatmul.mubr.bf16.vlgmr.msra.gmra.mrb[12].mxu0 %v1458_v17 }
 0x470   : > { %v1557_v25 = vpop.f32.mrb[8].mxu0  ;;  %v1680_v26 = vpop.f32.mrb[12].mxu1 }
 0x471   : > { %v2422_v27 = vpop.f32.mrb[9].mxu0  ;;  %v2442_v28 = vpop.f32.mrb[13].mxu1 }
 0x472   : > { %v1560_v29 = vpop.f32.mrb[10].mxu0  ;;  %v1683_v30 = vpop.f32.mrb[14].mxu1 }
 0x473   : > { %v2514_v31 = vpack.c.bf16 %v1560_v29, %v1557_v25  ;;  %v2518_v32 = vpack.c.bf16 %v1683_v30, %v1680_v26  ;;  %v2423_v33 = vpop.f32.mrb[11].mxu0  ;;  %v2443_v34 = vpop.f32.mrb[15].mxu1 }
 0x475   : > { %2515 = vmatprep.subr.bf16.mxu1 %v2514_v31 }
 0x476   : > { %2517 = vmatpush3.bf16.msra.mxu1 %v2514_v31 }
 0x477   : > { %2519 = vmatprep.subr.bf16.mxu1 %v2518_v32 }
 0x479   : > { %2449 = vmatmul.mubr.msk.f32.vlgmr.msra.gmra.mrb[16].mxu1 %vm1134_vm3, %v2960_v47 }
 0x47a   : > { %2521 = vmatpush3.bf16.msra.mxu1 %v2518_v32  ;;  %2475 = vmatprep.mubr.msk.f32.mxu1 %vm1134_vm3, %v2965_v48 }
 0x47d   : > { %2476 = vmatmul.mubr.msk.f32.vlgmr.msra.gmra.mrb[18].mxu1 %vm1134_vm3, %v2975_v49 }
 0x490   : > { %v1844_v6 = vpop.f32.mrb[12].mxu0 }
 0x491   : > { %v2469_v35 = vpop.f32.mrb[13].mxu0 }
 0x492   : > { %v1847_v36 = vpop.f32.mrb[14].mxu0 }
 0x493   : > { %v2470_v37 = vpop.f32.mrb[15].mxu0 }
 0x54c   : > { %v2450_v38 = vpop.f32.mrb[16].mxu1 }
 0x54d   : > { %v1848_v39 = vadd.f32 %v2450_v38, %v1847_v36  ;;  %v1753_v40 = vpop.f32.mrb[17].mxu1 }
 0x54e   : > { %v1845_v41 = vadd.f32 %v1844_v6, %v1753_v40 }
 0x550   : > { %v2477_v42 = vpop.f32.mrb[18].mxu1 }
 0x551   : > { %v1927_v44 = vadd.f32 %v2477_v42, %v1848_v39  ;;  %v1917_v45 = vpop.f32.mrb[19].mxu1 }
 0x552   : > { %v1926_v47 = vadd.f32 %v1917_v45, %v1845_v41 }
 0x553   : > { %v1936_v48 = vmul.f32 %v2212_v43, %v1927_v44 }
 0x554   : > { %v1935_v49 = vmul.f32 %v2212_v43, %v1926_v47 }
 0x555   : > { %v1945_v50 = vadd.f32 %v2213_v46, %v1936_v48 }
 0x556   : > { %v1944_v51 = vadd.f32 %v2213_v46, %v1935_v49 }
 0x557   : > { %v1947_v53 = vmax.f32 %v1945_v50, 0.0 }
 0x558   : > { %v1946_v52 = vmax.f32 %v1944_v51, 0.0 }
 0x559   : > { %1949 = vst [vmem:[%s486_s28 + $0x8] sm:$0xff] %v1947_v53 }
 0x55a   : > { %1948 = vst [vmem:[%s486_s28] sm:$0xff] %v1946_v52 }
 0x55b PF: > { %s24_s29 = sadd.s32 1, %s2615_s29  }
 0x55c   : > { %p21_p5 = scmp.ge.s32.totalorder %s24_s29, 4  }
 0x55e   :  { %23 = sbr.rel (!%p21_p5) target bundleno = 1 (0x1), region = 113 }

</bundles_post_ra>
